<compile_context>
chip_gen: v7x
topology: tpu7x:2x2x1
jax: 0.10.0
libtpu: 0.0.40
codegen_flags: <defaults>
</compile_context>

<pallas_src>
import math

import jax
import jax.numpy as jnp
from jax.experimental import pallas as pl
from jax.experimental.pallas import tpu as pltpu


def _epsilon_loss_kernel(side_ref, x0_ref, eps_ref, w_ref, out_ref):
    # Streamed slabs arrive as bf16; upcast to f32 for the arithmetic.
    x0 = x0_ref[...].astype(jnp.float32)      # (TBC, HW)
    eps = eps_ref[...].astype(jnp.float32)    # (TBC, HW)

    side = side_ref[...]                      # (TBC, 4) f32: [alpha, sigma, bias+t*t_w, 0]
    a = side[:, 0:1]
    s = side[:, 1:2]
    tbias = side[:, 2:3]

    # z_t = alpha(t) * x0 + sigma(t) * epsilon   (per-row scalars broadcast over lanes)
    z = a * x0 + s * eps

    # epsilon_hat = blockdiag(W) @ z + (bias + t * t_w)  — one MXU contraction per block
    eh = jnp.dot(w_ref[...], z, preferred_element_type=jnp.float32) + tbias

    err = eps - eh
    partial = jnp.sum(err * err)              # raw sum; final scaling done in JAX

    # lane-dense, unmasked store of the per-block partial sum
    out_ref[...] = jnp.broadcast_to(partial, out_ref.shape).astype(out_ref.dtype)


def _vmem_budget_bytes():
    """Generation-aware VMEM budget: ~half of physical, capped at 64 MiB."""
    phys = 128 * 1024 * 1024
    try:
        info = pltpu.get_tpu_info()
        phys = int(getattr(info, "vmem_capacity_bytes", phys))
    except Exception:
        pass
    return min(64 * 1024 * 1024, max(32 * 1024 * 1024, phys // 2))


def _choose_tb(B, C, HW, *, slab_bytes_cap, streamed_bytes=2, max_rows=512):
    """Batch elements per block.

    Constraints (in priority order):
      * TBC = TB*C is a multiple of 16 (bf16 sublane packing); multiple of 128 (MXU tile)
        when the batch is big enough to use it.
      * slab (TBC * HW * streamed_bytes) stays under the VMEM-derived byte cap.
      * TBC <= max_rows (block-diag kron matmul flop cap, v5e roofline).
      * TB <= ceil(B/2) when possible, so v7x's two TensorCores both get blocks.
    """
    row_bytes = C * HW * streamed_bytes
    tb_cap = max(1, min(slab_bytes_cap // row_bytes, max(1, max_rows // C)))

    m16 = 16 // math.gcd(C, 16)                  # mandatory bf16 alignment of TBC
    m128 = 128 // math.gcd(C, 128)               # preferred MXU-native alignment of TBC
    m = m128 if (m128 <= tb_cap and B >= m128) else m16

    half = -(-B // 2)                            # prefer >= 2 grid blocks (v7x megacore)
    if half >= m:
        tb_cap = min(tb_cap, half)

    tb = max(m, (tb_cap // m) * m)               # round down to alignment, floor at m
    tb = min(tb, m * (-(-B // m)))               # never pad batch beyond one alignment group
    return tb


def epsilon_loss(x0, t, eps, W, bias, t_w):
    """x0, eps: (B, C, H, W) f32 NCHW; t: (B,) f32; W: (C,C); bias, t_w: (C,1). Scalar loss."""
    B, C, H, Wd = x0.shape
    HW = H * Wd

    budget = _vmem_budget_bytes()
    # per-slab bf16 byte cap: 4 bf16 slab buffers + ~3 f32 intermediates + wbig + slack
    slab_cap = min(8 * 1024 * 1024, max(1 << 20, (budget - 6 * 1024 * 1024) // 10))

    TB = _choose_tb(B, C, HW, slab_bytes_cap=slab_cap)
    NB = pl.cdiv(B, TB)
    Bp = NB * TB
    TBC = TB * C

    # explicit VMEM-fit check (the alignment floor can overshoot the byte cap for huge C*HW)
    required = (
        4 * TBC * HW * 2          # x0/eps bf16 blocks, double-buffered
        + 3 * TBC * HW * 4        # f32 intermediates (z, eh, headroom)
        + 2 * TBC * TBC * 4       # block-diag W, double-buffered
        + 2 * TBC * 4 * 4         # side columns, double-buffered
        + 2 * 8 * 128 * 4         # output tile, double-buffered
        + (1 << 20)               # compiler scratch slack
    )
    if required > budget:
        raise ValueError(
            f"Epsilon kernel block (TBC={TBC}, HW={HW}) needs ~{required} B of VMEM, "
            f"budget is {budget} B; reduce C*H*W or add HW blocking.")

    # (B*C, HW) row-major flatten (free reshape of contiguous NCHW); row index = b*C + c
    x0f = x0.astype(jnp.float32).reshape(B * C, HW)
    epsf = eps.astype(jnp.float32).reshape(B * C, HW)

    t = t.astype(jnp.float32)
    alpha = jnp.cos(jnp.pi / 2.0 * t)                                   # sched.alpha(t)
    sigma = jnp.sin(jnp.pi / 2.0 * t)                                   # sched.sigma(t)
    tbias = (bias[None, :, 0] + t[:, None] * t_w[None, :, 0]).reshape(B * C)
    side = jnp.stack(
        [jnp.repeat(alpha, C), jnp.repeat(sigma, C), tbias,
         jnp.zeros((B * C,), jnp.float32)], axis=1).astype(jnp.float32)  # (B*C, 4)

    if Bp > B:
        # zero-pad extra batch rows: alpha=sigma=tbias=0 -> z=0, eh=0, err=0 -> 0 contribution
        pad = ((0, (Bp - B) * C), (0, 0))
        x0f = jnp.pad(x0f, pad)
        epsf = jnp.pad(epsf, pad)
        side = jnp.pad(side, pad)

    # bf16 streaming of the two big slabs (kernel upcasts to f32 before the math)
    x0f = x0f.astype(jnp.bfloat16)
    epsf = epsf.astype(jnp.bfloat16)

    # Block-diagonal weight so TB batch elements get the 1x1 conv in one matmul,
    # with no in-kernel transposes.
    wbig = jnp.kron(jnp.eye(TB, dtype=jnp.float32), W.astype(jnp.float32))

    cost = pl.CostEstimate(
        flops=2 * TBC * TBC * HW * NB + 6 * Bp * C * HW,
        transcendentals=0,
        bytes_accessed=(2 * Bp * C * HW * 2        # bf16 x0 + eps
                        + Bp * C * 4 * 4           # side columns
                        + TBC * TBC * 4            # wbig (fetched once)
                        + NB * 8 * 128 * 4),       # partial-sum tiles
    )

    out = pl.pallas_call(
        _epsilon_loss_kernel,
        out_shape=jax.ShapeDtypeStruct((NB * 8, 128), jnp.float32),
        grid=(NB,),
        in_specs=[
            pl.BlockSpec((TBC, 4), lambda nb: (nb, 0)),        # [alpha, sigma, bias+t*t_w, 0]
            pl.BlockSpec((TBC, HW), lambda nb: (nb, 0)),       # x0 slab (bf16)
            pl.BlockSpec((TBC, HW), lambda nb: (nb, 0)),       # epsilon slab (bf16)
            pl.BlockSpec((TBC, TBC), lambda nb: (0, 0)),       # block-diag W (full, reused)
        ],
        out_specs=pl.BlockSpec((8, 128), lambda nb: (nb, 0)),  # per-block partial-sum tile
        compiler_params=pltpu.CompilerParams(
            dimension_semantics=("parallel",),                 # independent blocks -> megacore
            vmem_limit_bytes=budget,
        ),
        cost_estimate=cost,
    )(side, x0f, epsf, wbig)

    partial_sums = out.reshape(NB, 8, 128)[:, 0, 0]
    # mean over batch of per-sample means == total sum / (B*C*H*W)
    return jnp.sum(partial_sums) / (B * C * HW)


def epsilon_loss_ref(x0, t, eps, W, bias, t_w):
    """Pure-JAX f32 reference mirroring the PyTorch forward."""
    B, C, H, Wd = x0.shape
    alpha = jnp.cos(jnp.pi / 2.0 * t).reshape(B, 1, 1, 1)
    sigma = jnp.sin(jnp.pi / 2.0 * t).reshape(B, 1, 1, 1)
    z = alpha * x0 + sigma * eps
    zf = z.reshape(B, C, H * Wd)
    eh = jnp.einsum('oc,bcn->bon', W, zf) + bias[None] + t.reshape(B, 1, 1) * t_w[None]
    eh = eh.reshape(B, C, H, Wd)
    err = (eps - eh) ** 2
    per_sample = jnp.mean(err.reshape(B, -1), axis=1)
    return jnp.mean(per_sample)


if __name__ == "__main__":
    B, C, H, W = 2, 8, 16, 16   # small shapes; C=8 keeps sublanes aligned, H*W=256 lane-dense

    key = jax.random.PRNGKey(0)
    k_x0, k_eps, k_t, k_w, k_b, k_tw = jax.random.split(key, 6)

    x0 = jax.random.normal(k_x0, (B, C, H, W), dtype=jnp.float32)
    eps = jax.random.normal(k_eps, (B, C, H, W), dtype=jnp.float32)   # torch.randn(*x0.shape)
    t = jax.random.uniform(k_t, (B,), dtype=jnp.float32)

    # Deterministic synthetic parameters for param.epsilon (1x1-conv denoiser).
    Wp = jax.random.normal(k_w, (C, C), dtype=jnp.float32) * 0.1
    bias = jax.random.normal(k_b, (C, 1), dtype=jnp.float32) * 0.05
    t_w = jax.random.normal(k_tw, (C, 1), dtype=jnp.float32) * 0.05

    loss = jax.block_until_ready(epsilon_loss(x0, t, eps, Wp, bias, t_w))
    loss_ref = jax.block_until_ready(epsilon_loss_ref(x0, t, eps, Wp, bias, t_w))

    assert jnp.isfinite(loss), "non-finite loss"
    # tolerance covers bf16 streaming of x0/eps (MSE loss; see header comment)
    assert jnp.allclose(loss, loss_ref, rtol=5e-3, atol=5e-3), (loss, loss_ref)
    print("KERNEL_OK")
</pallas_src>

<mosaic_0001>
module attributes {stable_mosaic.version = 11 : i64} {
  func.func @_epsilon_loss_kernel(%arg0: i32, %arg1: memref<16x4xf32, #tpu.memory_space<vmem>>, %arg2: memref<16x256xbf16, #tpu.memory_space<vmem>>, %arg3: memref<16x256xbf16, #tpu.memory_space<vmem>>, %arg4: memref<16x16xf32, #tpu.memory_space<vmem>>, %arg5: memref<8x128xf32, #tpu.memory_space<vmem>>) attributes {dimension_semantics = [#tpu.dimension_semantics<parallel>], iteration_bounds = array<i64: 1>, scalar_prefetch = 0 : i64, scratch_operands = 0 : i64, tpu.core_type = #tpu.core_type<tc>, window_params = [{transform_indices = @transform_0, window_bounds = array<i64: 16, 4>}, {transform_indices = @transform_1, window_bounds = array<i64: 16, 256>}, {transform_indices = @transform_2, window_bounds = array<i64: 16, 256>}, {pipeline_mode = #tpu.pipeline_mode<synchronous>, transform_indices = @transform_3, window_bounds = array<i64: 16, 16>}, {transform_indices = @transform_4, window_bounds = array<i64: 8, 128>}]} {
    %c0 = arith.constant 0 : index
    %c0_0 = arith.constant 0 : index
    %0 = vector.load %arg2[%c0, %c0_0] : memref<16x256xbf16, #tpu.memory_space<vmem>>, vector<16x256xbf16>
    %1 = arith.extf %0 : vector<16x256xbf16> to vector<16x256xf32>
    %c0_1 = arith.constant 0 : index
    %c0_2 = arith.constant 0 : index
    %2 = vector.load %arg3[%c0_1, %c0_2] : memref<16x256xbf16, #tpu.memory_space<vmem>>, vector<16x256xbf16>
    %3 = arith.extf %2 : vector<16x256xbf16> to vector<16x256xf32>
    %c0_3 = arith.constant 0 : index
    %c0_4 = arith.constant 0 : index
    %4 = vector.load %arg1[%c0_3, %c0_4] : memref<16x4xf32, #tpu.memory_space<vmem>>, vector<16x4xf32>
    %5 = vector.extract_strided_slice %4 {offsets = [0, 0], sizes = [16, 1], strides = [1, 1]} : vector<16x4xf32> to vector<16x1xf32>
    %6 = vector.extract_strided_slice %4 {offsets = [0, 1], sizes = [16, 1], strides = [1, 1]} : vector<16x4xf32> to vector<16x1xf32>
    %7 = vector.extract_strided_slice %4 {offsets = [0, 2], sizes = [16, 1], strides = [1, 1]} : vector<16x4xf32> to vector<16x1xf32>
    %8 = vector.broadcast %5 : vector<16x1xf32> to vector<16x256xf32>
    %9 = arith.mulf %8, %1 : vector<16x256xf32>
    %10 = vector.broadcast %6 : vector<16x1xf32> to vector<16x256xf32>
    %11 = arith.mulf %10, %3 : vector<16x256xf32>
    %12 = arith.addf %9, %11 : vector<16x256xf32>
    %c0_5 = arith.constant 0 : index
    %c0_6 = arith.constant 0 : index
    %13 = vector.load %arg4[%c0_5, %c0_6] : memref<16x16xf32, #tpu.memory_space<vmem>>, vector<16x16xf32>
    %cst = arith.constant dense<0.000000e+00> : vector<16x256xf32>
    %14 = tpu.matmul %13, %12, %cst {dimension_numbers = #tpu.dot_dimension_numbers<[1], [0], [0], [1], [0, 0, 1, 1], [], []>} : vector<16x16xf32>, vector<16x256xf32>, vector<16x256xf32> -> vector<16x256xf32>
    %15 = vector.broadcast %7 : vector<16x1xf32> to vector<16x256xf32>
    %16 = arith.addf %14, %15 : vector<16x256xf32>
    %17 = arith.subf %3, %16 : vector<16x256xf32>
    %18 = arith.mulf %17, %17 : vector<16x256xf32>
    %19 = vector.shape_cast %18 : vector<16x256xf32> to vector<1x16x256xf32>
    %cst_7 = arith.constant dense<0.000000e+00> : vector<1xf32>
    %20 = vector.multi_reduction <add>, %19, %cst_7 [1, 2] : vector<1x16x256xf32> to vector<1xf32>
    %21 = vector.shape_cast %20 : vector<1xf32> to vector<1x1x1xf32>
    %22 = vector.extract %21[0, 0, 0] : f32 from vector<1x1x1xf32>
    %23 = vector.broadcast %22 : f32 to vector<8x128xf32>
    %c0_8 = arith.constant 0 : index
    %c0_9 = arith.constant 0 : index
    %24 = vector.load %arg5[%c0_8, %c0_9] : memref<8x128xf32, #tpu.memory_space<vmem>>, vector<8x128xf32>
    tpu.vector_store %arg5[%c0_8, %c0_9], %23 {strides = array<i32>} : memref<8x128xf32, #tpu.memory_space<vmem>>, vector<8x128xf32>,
    return
  }
  func.func @transform_0(%arg0: i32) -> (i32, i32) {
    %c0_i32 = arith.constant 0 : i32
    %c0_i32_0 = arith.constant 0 : i32
    return %arg0, %c0_i32 : i32, i32
  }
  func.func @transform_1(%arg0: i32) -> (i32, i32) {
    %c0_i32 = arith.constant 0 : i32
    %c0_i32_0 = arith.constant 0 : i32
    return %arg0, %c0_i32 : i32, i32
  }
  func.func @transform_2(%arg0: i32) -> (i32, i32) {
    %c0_i32 = arith.constant 0 : i32
    %c0_i32_0 = arith.constant 0 : i32
    return %arg0, %c0_i32 : i32, i32
  }
  func.func @transform_3(%arg0: i32) -> (i32, i32) {
    %c0_i32 = arith.constant 0 : i32
    %c0_i32_0 = arith.constant 0 : i32
    %c0_i32_1 = arith.constant 0 : i32
    return %c0_i32, %c0_i32_0 : i32, i32
  }
  func.func @transform_4(%arg0: i32) -> (i32, i32) {
    %c0_i32 = arith.constant 0 : i32
    %c0_i32_0 = arith.constant 0 : i32
    return %arg0, %c0_i32 : i32, i32
  }
}

</mosaic_0001>

<bundles_post_ra>
// kernel: tpu_custom_call.1
= control target key start
LH: loop header
LB: loop body
LE: loop exit
PB: predicated region body
PF: predicated region fallthrough
CT: control target
= control target key end

     0   :  { %9 = vsyncpa [#allocation3], 0  ;;  %s515_s0 = inlined_call_operand.hbm [shape: f32[16,4], index: 0, kind: input, shape index: {}]   ;;  %s516_s1 = inlined_call_operand.hbm [shape: bf16[16,256], index: 1, kind: input, shape index: {}]   ;;  %s517_s2 = inlined_call_operand.hbm [shape: bf16[16,256], index: 2, kind: input, shape index: {}]   ;;  %s518_s3 = inlined_call_operand.hbm [shape: f32[16,16], index: 3, kind: input, shape index: {}]   ;;  %s519_s4 = inlined_call_operand.hbm [shape: f32[8,128], index: 4, kind: output, shape index: {}]  }
   0x1   :  { %10 = vsyncpa [#allocation6], 0 }
   0x2   :  { %11 = vsyncpa [#allocation9], 0 }
   0x3   :  { %12 = vsyncpa [#allocation4], 0  ;;  %s393_s15 = smov [#allocation5]   ;;  %s394_s17 = smov [#allocation2]  }
   0x4   :  { %s30_s16 = sshll.u32 %s393_s15, 4  ;;  %s18_s18 = sshll.u32 %s394_s17, 4  ;;  %s31_s16 = int_to_ptr.vmem [resolvable:$true] %s30_s16  ;;  %s429_s18 = int_to_ptr.vmem [resolvable:$true] %s18_s18 }
   0x5   :  { %s275_s21 = scalar_lea.hbm %s516_s1, 256 }
   0x6   :  { %p276_p0 = scmp.ne.s32.totalorder %s516_s1, %s275_s21  ;;  %p279_p1 = scmp.lt.u32.totalorder %s275_s21, %s516_s1 }
   0x8   :  { %p281_p2 = pnand %p279_p1, %p276_p0 }
   0xa   :  { %284 = shalt.err (!%p281_p2)
}
   0xb   :  { %s285_s26 = scalar_lea.vmem %s31_s16, 256  ;;  %p290_p4 = scmp.lt.s32.totalorder %s31_s16, %s31_s16 }
   0xc   :  { %p286_p3 = scmp.ne.s32.totalorder %s31_s16, %s285_s26  ;;  %p291_p5 = scmp.lt.s32.totalorder %s285_s26, %s285_s26 }
   0xe   :  { %p292_p6 = por %p291_p5, %p290_p4 }
  0x10   :  { %p293_p7 = pnand %p292_p6, %p286_p3 }
  0x12   :  { %296 = shalt.err (!%p293_p7)
}
  0x13   :  { %s395_s27 = smov 128   ;;  %s396_s28 = smov 8  }
  0x14   :  { %36 = dma.hbm_to_vmem [thread:$0]  %s516_s1, 256, %s31_s16, [#allocation6], %s395_s27, %s395_s27, %s396_s28  }
  0x15   :  { %s297_s7 = scalar_lea.hbm %s515_s0, 256 }
  0x16   :  { %p298_p8 = scmp.ne.s32.totalorder %s515_s0, %s297_s7  ;;  %p301_p9 = scmp.lt.u32.totalorder %s297_s7, %s515_s0 }
  0x18   :  { %p303_p10 = pnand %p301_p9, %p298_p8 }
  0x1a   :  { %306 = shalt.err (!%p303_p10)
}
  0x1b   :  { %s307_s12 = scalar_lea.vmem %s429_s18, 256  ;;  %p312_p12 = scmp.lt.s32.totalorder %s429_s18, %s429_s18 }
  0x1c   :  { %p308_p11 = scmp.ne.s32.totalorder %s429_s18, %s307_s12  ;;  %p313_p13 = scmp.lt.s32.totalorder %s307_s12, %s307_s12 }
  0x1e   :  { %p314_p0 = por %p313_p13, %p312_p12 }
  0x20   :  { %p315_p1 = pnand %p314_p0, %p308_p11 }
  0x22   :  { %318 = shalt.err (!%p315_p1)
}
  0x23   :  { %24 = dma.hbm_to_vmem [thread:$0]  %s515_s0, 256, %s429_s18, [#allocation3], %s395_s27, %s395_s27, %s396_s28  }
  0x24   :  { %s397_s14 = smov [#allocation7]   ;;  %s398_s16 = smov [#allocation8]  }
  0x25   :  { %s42_s15 = sshll.u32 %s397_s14, 4  ;;  %s54_s17 = sshll.u32 %s398_s16, 4  ;;  %s43_s15 = int_to_ptr.vmem [resolvable:$true] %s42_s15  ;;  %s466_s17 = int_to_ptr.vmem [resolvable:$true] %s54_s17 }
  0x26   :  { %s319_s21 = scalar_lea.hbm %s517_s2, 256 }
  0x27   :  { %p320_p2 = scmp.ne.s32.totalorder %s517_s2, %s319_s21  ;;  %p323_p3 = scmp.lt.u32.totalorder %s319_s21, %s517_s2 }
  0x29   :  { %p325_p4 = pnand %p323_p3, %p320_p2 }
  0x2b   :  { %328 = shalt.err (!%p325_p4)
}
  0x2c   :  { %s329_s0 = scalar_lea.vmem %s43_s15, 256  ;;  %p334_p6 = scmp.lt.s32.totalorder %s43_s15, %s43_s15 }
  0x2d   :  { %p330_p5 = scmp.ne.s32.totalorder %s43_s15, %s329_s0  ;;  %p335_p7 = scmp.lt.s32.totalorder %s329_s0, %s329_s0 }
  0x2f   :  { %p336_p8 = por %p335_p7, %p334_p6 }
  0x31   :  { %p337_p9 = pnand %p336_p8, %p330_p5 }
  0x33   :  { %340 = shalt.err (!%p337_p9)
}
  0x34   :  { %48 = dma.hbm_to_vmem [thread:$0]  %s517_s2, 256, %s43_s15, [#allocation6], %s395_s27, %s395_s27, %s396_s28  }
  0x35   :  { %s341_s5 = scalar_lea.hbm %s518_s3, 256 }
  0x36   :  { %p342_p10 = scmp.ne.s32.totalorder %s518_s3, %s341_s5  ;;  %p345_p11 = scmp.lt.u32.totalorder %s341_s5, %s518_s3 }
  0x38   :  { %p347_p12 = pnand %p345_p11, %p342_p10 }
  0x3a   :  { %350 = shalt.err (!%p347_p12)
}
  0x3b   :  { %s351_s10 = scalar_lea.vmem %s466_s17, 256  ;;  %p356_p0 = scmp.lt.s32.totalorder %s466_s17, %s466_s17 }
  0x3c   :  { %p352_p13 = scmp.ne.s32.totalorder %s466_s17, %s351_s10  ;;  %p357_p1 = scmp.lt.s32.totalorder %s351_s10, %s351_s10 }
  0x3e   :  { %p358_p2 = por %p357_p1, %p356_p0 }
  0x40   :  { %p359_p3 = pnand %p358_p2, %p352_p13 }
  0x42   :  { %362 = shalt.err (!%p359_p3)
}
  0x43   :  { %60 = dma.hbm_to_vmem [thread:$0]  %s518_s3, 256, %s466_s17, [#allocation9], %s395_s27, %s395_s27, %s396_s28  }
  0x44   :  { %385 = dma.done.wait [#allocation3], 256  }
  0x45   :  { %386 = vsyncadd [#allocation3], 4294967040 }
  0x46   :  { %387 = dma.done.wait [#allocation6], 512  }
  0x47   :  { %388 = vsyncadd [#allocation6], 4294966784 }
  0x48   :  { %389 = dma.done.wait [#allocation9], 256  }
  0x49   :  { %390 = vsyncadd [#allocation9], 4294967040  ;;  %v399_v0 = vmov 1   ;;  %v400_v1 = vmov 0   ;;  %v85_v2 = vld [vmem:[#allocation2] sm:$0xff]  ;;  %v86_v3 = vld [vmem:[#allocation2 + $0x8] sm:$0xff] }
  0x4a   :  { %272 = vset.pattern.permute.xlu1 %v399_v0  ;;  %271 = vset.pattern.permute.xlu0 %v400_v1  ;;  %v401_v4 = vmov 0.0   ;;  %v402_v5 = vmov 2   ;;  %v79_v6 = vld [vmem:[#allocation7] sm:$0xff]  ;;  %v73_v7 = vld [vmem:[#allocation5] sm:$0xff]  ;;  %v80_v8 = vld [vmem:[#allocation7 + $0x8] sm:$0xff]  ;;  %vm127_vm0 = vcmask 130048  }
  0x4b   :  { %102 = vperm.xlu1 %272, %v85_v2   ;;  %89 = vperm.xlu0 %271, %v85_v2   ;;  %v74_v9 = vld [vmem:[#allocation5 + $0x8] sm:$0xff]  ;;  %v81_v10 = vunpack.c.l.bf16 %v79_v6  ;;  %v82_v11 = vunpack.c.h.bf16 %v79_v6  ;;  %v75_v12 = vunpack.c.l.bf16 %v73_v7  ;;  %v76_v13 = vunpack.c.h.bf16 %v73_v7  ;;  %v117_v36 = vld [vmem:[#allocation8] sm:$0xff]  ;;  %s403_s3 = smov [#allocation10]  }
  0x4c   :  { %198 = vmatprep.mubr.f32.mxu0 %v401_v4  ;;  %204 = vmatprep.mubr.f32.mxu1 %v401_v4  ;;  %v83_v16 = vunpack.c.l.bf16 %v80_v8  ;;  %v84_v17 = vunpack.c.h.bf16 %v80_v8  ;;  %v77_v18 = vunpack.c.l.bf16 %v74_v9  ;;  %v78_v19 = vunpack.c.h.bf16 %v74_v9  ;;  %v118_v37 = vld [vmem:[#allocation8 + $0x8] sm:$0xff]  ;;  %s239_s27 = sshll.u32 %s403_s3, 4  ;;  %s240_s27 = int_to_ptr.vmem [resolvable:$true] %s239_s27 }
  0x4d   :  { %s363_s12 = scalar_lea.vmem %s240_s27, 128  ;;  %p368_p5 = scmp.lt.s32.totalorder %s240_s27, %s240_s27 }
  0x4e   :  { %p364_p4 = scmp.ne.s32.totalorder %s240_s27, %s363_s12  ;;  %p369_p6 = scmp.lt.s32.totalorder %s363_s12, %s363_s12 }
  0x4f   :  { %106 = vperm.xlu1 %272, %v86_v3   ;;  %94 = vperm.xlu0 %271, %v86_v3  }
  0x50   :  { %p370_p7 = por %p369_p6, %p368_p5 }
  0x52   :  { %p371_p8 = pnand %p370_p7, %p364_p4 }
  0x53   :  { %273 = vset.pattern.permute.xlu0 %v402_v5  ;;  %274 = vset.pattern.permute.xlu1 %v402_v5 }
  0x54   :  { %120 = vperm.xlu0 %273, %v85_v2   ;;  %124 = vperm.xlu1 %274, %v86_v3  }
  0xca   :  { %v103_v14 = vpop.permute.xlu1 %102  ;;  %v90_v15 = vpop.permute.xlu0 %89 }
  0xcb   :  { %v109_v20 = vmul.f32 %v103_v14, %v81_v10  ;;  %v110_v21 = vmul.f32 %v103_v14, %v82_v11  ;;  %v97_v22 = vmul.f32 %v90_v15, %v75_v12  ;;  %v98_v23 = vmul.f32 %v90_v15, %v76_v13 }
  0xcd   :  { %v114_v30 = vadd.f32 %v110_v21, %v98_v23  ;;  %v113_v32 = vadd.f32 %v109_v20, %v97_v22 }
  0xce   :  { %v107_v24 = vpop.permute.xlu1 %106  ;;  %v95_v25 = vpop.permute.xlu0 %94 }
  0xcf   :  { %v111_v26 = vmul.f32 %v107_v24, %v83_v16  ;;  %v112_v27 = vmul.f32 %v107_v24, %v84_v17  ;;  %v99_v28 = vmul.f32 %v95_v25, %v77_v18  ;;  %v100_v29 = vmul.f32 %v95_v25, %v78_v19 }
  0xd1   :  { %v116_v31 = vadd.f32 %v112_v27, %v100_v29  ;;  %v115_v33 = vadd.f32 %v111_v26, %v99_v28 }
  0xd3   :  { %v252_v34 = vpack.c.bf16 %v116_v31, %v114_v30  ;;  %v254_v35 = vpack.c.bf16 %v115_v33, %v113_v32  ;;  %v121_v38 = vpop.permute.xlu0 %120  ;;  %v125_v39 = vpop.permute.xlu1 %124 }
  0xd5   :  { %253 = vmatprep.subr.bf16.mxu0 %v252_v34  ;;  %256 = vmatprep.subr.bf16.mxu1 %v252_v34 }
  0xd6   :  { %255 = vmatpush1.bf16.msra.mxu0 %v254_v35  ;;  %257 = vmatpush1.bf16.msra.mxu1 %v254_v35 }
  0xd9   :  { %250 = vmatmul.mubr.msk.f32.vlgmr.msra.gmra.mrb[0].mxu0 %vm127_vm0, %v117_v36  ;;  %251 = vmatmul.mubr.msk.f32.vlgmr.msra.gmra.mrb[0].mxu1 %vm127_vm0, %v118_v37 }
 0x1ac   :  { %v200_v40 = vpop.f32.mrb[0].mxu0  ;;  %v206_v41 = vpop.f32.mrb[0].mxu1 }
 0x1ad   :  { %v201_v42 = vadd.f32 %v200_v40, %v121_v38  ;;  %v202_v43 = vpop.f32.mrb[1].mxu0  ;;  %v207_v44 = vadd.f32 %v206_v41, %v125_v39  ;;  %v208_v45 = vpop.f32.mrb[1].mxu1 }
 0x1ae   :  { %v203_v46 = vadd.f32 %v202_v43, %v121_v38  ;;  %v209_v47 = vadd.f32 %v208_v45, %v125_v39 }
 0x1af   :  { %v211_v48 = vsub.f32 %v81_v10, %v201_v42  ;;  %v213_v49 = vsub.f32 %v83_v16, %v207_v44 }
 0x1b0   :  { %v212_v50 = vsub.f32 %v82_v11, %v203_v46  ;;  %v214_v54 = vsub.f32 %v84_v17, %v209_v47 }
 0x1b1   :  { %v215_v51 = vmul.f32 %v211_v48, %v211_v48  ;;  %v217_v53 = vmul.f32 %v213_v49, %v213_v49 }
 0x1b2   :  { %v216_v52 = vmul.f32 %v212_v50, %v212_v50  ;;  %v218_v56 = vmul.f32 %v214_v54, %v214_v54 }
 0x1b4   :  { %v219_v55 = vadd.f32 %v216_v52, %v215_v51 }
 0x1b6   :  { %v220_v57 = vadd.f32 %v219_v55, %v217_v53 }
 0x1b8   :  { %v221_v58 = vadd.f32 %v220_v57, %v218_v56 }
 0x1ba   :  { %222 = vadd.xlane.f32.xlu1 %v221_v58 }
 0x247   :  { %v223_v59 = vpop.xlane.xlu1 %222 }
 0x248   :  { %v224_v60 = vrot.slane %v223_v59, 4 }
 0x24a   :  { %v225_v61 = vadd.f32 %v224_v60, %v223_v59 }
 0x24c   :  { %v226_v62 = vrot.slane %v225_v61, 2 }
 0x24e   :  { %v227_v63 = vadd.f32 %v226_v62, %v225_v61 }
 0x250   :  { %v228_v0 = vrot.slane %v227_v63, 1 }
 0x252   :  { %v229_v1 = vadd.f32 %v228_v0, %v227_v63 }
 0x254   :  { %258 = vpush %v229_v1 }
 0x285   :  { %s259_s28 = spop %258 }
 0x286   :  { %v231_v2 = vstv %s259_s28 }
 0x287   :  { %232 = vst [vmem:[#allocation10] sm:$0xff] %v231_v2 }
 0x288   :  { %374 = shalt.err (!%p371_p8)
}
 0x289   :  { %s375_s14 = scalar_lea.hbm %s519_s4, 128 }
 0x28a   :  { %p376_p9 = scmp.ne.s32.totalorder %s519_s4, %s375_s14  ;;  %p379_p10 = scmp.lt.u32.totalorder %s375_s14, %s519_s4 }
 0x28c   :  { %p381_p11 = pnand %p379_p10, %p376_p9 }
 0x28e   :  { %384 = shalt.err (!%p381_p11)
}
 0x28f   :  { %242 = dma.vmem_to_hbm [thread:$0]  %s240_s27, 128, %s519_s4, [#allocation4]  }
 0x290   :  { %391 = dma.done.wait [#allocation4], 128  }
 0x291   :  { %392 = vsyncadd [#allocation4], 4294967168 }
 0x292   :  { %246 = vsyncpa [#allocation3], 1 }
 0x293   :  { %247 = vsyncpa [#allocation6], 1 }
 0x294   :  { %248 = vsyncpa [#allocation9], 1 }
 0x295   :  { %249 = vsyncpa [#allocation4], 1 }

</bundles_post_ra>
